<compile_context>
chip_gen: v6e
topology: v6e:2x2x1
jax: 0.10.0
libtpu: 0.0.40
codegen_flags: <defaults>
</compile_context>

<pallas_src>
import functools

import jax
import jax.numpy as jnp
from jax import lax
from jax.experimental import pallas as pl
from jax.experimental.pallas import tpu as pltpu

_LANES = 128


def _edge_penalty_kernel(budget_ref, ep_ref, out_ref, sum_ref, sq_ref, *,
                         rows_total, block_rows):
    i = pl.program_id(0)
    nsteps = pl.num_programs(0)

    @pl.when(i == 0)
    def _init():
        sum_ref[...] = jnp.zeros_like(sum_ref)
        sq_ref[...] = jnp.zeros_like(sq_ref)

    v = ep_ref[...].astype(jnp.float32)                        # [block_rows, 128]

    # Mask the ragged final block (only emitted when raggedness exists at all).
    rem = rows_total % block_rows
    if rem != 0:
        limit = jnp.where(i == nsteps - 1, rem, block_rows)    # scalar
        row_idx = lax.broadcasted_iota(jnp.int32, v.shape, 0)
        v = jnp.where(row_idx < limit, v, 0.0)                 # BEFORE square/sum

    # Steady state: pure VPU adds into full (8,128) vreg accumulators.
    v8 = v.reshape(block_rows // 8, 8, _LANES)
    sum_ref[...] += jnp.sum(v8, axis=0)                        # [8, 128]
    sq_ref[...] += jnp.sum(v8 * v8, axis=0)                    # [8, 128]

    @pl.when(i == nsteps - 1)
    def _finalize():
        s = jnp.sum(sum_ref[...], keepdims=True)               # [1, 1] total sum
        ss = jnp.sum(sq_ref[...], keepdims=True)               # [1, 1] sum of squares

        l2 = jnp.sqrt(ss)                                      # torch.norm(p=2)

        # Numerically stable softplus (matches F.softplus incl. linear regime):
        # softplus(z) = max(z, 0) + log1p(exp(-|z|))
        z = s - budget_ref[0, 0]
        sp = jnp.maximum(z, 0.0) + jnp.log1p(jnp.exp(-jnp.abs(z)))

        out_ref[...] = l2 + sp * sp


def edge_penalty(edge_probs, edge_budget=0.0, *, tile_rows=2048):
    """Mirror of EdgePenalty.forward. Returns a scalar jnp.float32."""
    ep = jnp.ravel(edge_probs)
    n = ep.shape[0]

    if n == 0:
        # Empty edge set: L2 = 0, budget_pen = softplus(-budget)^2.
        z = -jnp.asarray(edge_budget, jnp.float32)
        sp = jnp.maximum(z, 0.0) + jnp.log1p(jnp.exp(-jnp.abs(z)))
        return sp * sp

    rows = pl.cdiv(n, _LANES)
    # Pad ONLY to the next multiple of 128 lanes (at most 127 elements),
    # and only when needed.  Ragged row-blocks are masked in-kernel instead.
    pad = rows * _LANES - n
    if pad:
        ep = jnp.pad(ep, (0, pad))                             # zeros: exact no-op
    ep2d = ep.reshape(rows, _LANES)

    # Dtype-agnostic sublane alignment (32 covers f32/bf16/int8 min tiles).
    tile_rows = max(32, (int(tile_rows) // 32) * 32)
    block_rows = min(tile_rows, -(-rows // 32) * 32)
    grid_steps = pl.cdiv(rows, block_rows)

    budget = jnp.asarray(edge_budget, jnp.float32).reshape(1, 1)

    kernel = functools.partial(_edge_penalty_kernel,
                               rows_total=rows, block_rows=block_rows)

    out = pl.pallas_call(
        kernel,
        out_shape=jax.ShapeDtypeStruct((1, 1), jnp.float32),
        grid=(grid_steps,),
        in_specs=[pl.BlockSpec(memory_space=pltpu.MemorySpace.SMEM),   # budget scalar
                  pl.BlockSpec((block_rows, _LANES), lambda i: (i, 0))],
        out_specs=pl.BlockSpec((1, 1), lambda i: (0, 0)),      # resident output block
        scratch_shapes=[pltpu.VMEM((8, _LANES), jnp.float32),  # per-vreg sum
                        pltpu.VMEM((8, _LANES), jnp.float32)], # per-vreg sum of squares
        compiler_params=pltpu.CompilerParams(
            dimension_semantics=("arbitrary",)),               # sequential reduction axis
    )(budget, ep2d)
    return out[0, 0]


def _edge_penalty_ref(edge_probs, edge_budget=0.0):
    """Pure-JAX reference of the PyTorch module."""
    l2 = jnp.sqrt(jnp.sum(jnp.square(edge_probs)))
    bp = jax.nn.softplus(jnp.sum(edge_probs) - edge_budget) ** 2
    return l2 + bp


if __name__ == "__main__":
    key = jax.random.PRNGKey(0)
    k1, k2, k3 = jax.random.split(key, 3)

    # Case 1: small tiles -> multi-step grid with a ragged final block
    # (exercises init / accumulate / masked-tail / finalize).
    E1 = 5000
    probs1 = jax.nn.sigmoid(jax.random.normal(k1, (E1,), jnp.float32))
    out1 = edge_penalty(probs1, edge_budget=0.0, tile_rows=32)

    # Case 2: small edge set, default (large) tiles -> single ragged block.
    E2 = 1000
    probs2 = jax.nn.sigmoid(jax.random.normal(k2, (E2,), jnp.float32))
    out2 = edge_penalty(probs2, edge_budget=480.0)

    # Case 3: exact multiple of block size -> no masking path emitted.
    E3 = 8192
    probs3 = jax.nn.sigmoid(jax.random.normal(k3, (E3,), jnp.float32))
    out3 = edge_penalty(probs3, edge_budget=100.0, tile_rows=32)

    out1, out2, out3 = jax.block_until_ready((out1, out2, out3))

    ref1 = _edge_penalty_ref(probs1, 0.0)
    ref2 = _edge_penalty_ref(probs2, 480.0)
    ref3 = _edge_penalty_ref(probs3, 100.0)

    assert out1.shape == () and out2.shape == () and out3.shape == ()
    assert jnp.allclose(out1, ref1, rtol=1e-4, atol=1e-4), (out1, ref1)
    assert jnp.allclose(out2, ref2, rtol=1e-4, atol=1e-4), (out2, ref2)
    assert jnp.allclose(out3, ref3, rtol=1e-4, atol=1e-4), (out3, ref3)
    print("KERNEL_OK")
</pallas_src>

<mosaic_0001>
module attributes {stable_mosaic.version = 11 : i64} {
  func.func @_edge_penalty_kernel(%arg0: i32, %arg1: memref<1x1xf32, #tpu.memory_space<smem>>, %arg2: memref<32x128xf32, #tpu.memory_space<vmem>>, %arg3: memref<1x1xf32, #tpu.memory_space<vmem>>, %arg4: memref<8x128xf32, #tpu.memory_space<vmem>>, %arg5: memref<8x128xf32, #tpu.memory_space<vmem>>) attributes {dimension_semantics = [#tpu.dimension_semantics<arbitrary>], iteration_bounds = array<i64: 2>, scalar_prefetch = 0 : i64, scratch_operands = 2 : i64, tpu.core_type = #tpu.core_type<tc>, window_params = [{transform_indices = @transform_0, window_bounds = array<i64: 1, 1>}, {transform_indices = @transform_1, window_bounds = array<i64: 32, 128>}, {pipeline_mode = #tpu.pipeline_mode<synchronous>, transform_indices = @transform_2, window_bounds = array<i64: 1, 1>}]} {
    %c0_i32 = arith.constant 0 : i32
    %0 = arith.cmpi eq, %arg0, %c0_i32 : i32
    %1 = arith.extui %0 : i1 to i32
    %c0_i32_0 = arith.constant 0 : i32
    %2 = arith.cmpi ne, %1, %c0_i32_0 : i32
    scf.if %2 {
      %cst_14 = arith.constant 0.000000e+00 : f32
      %24 = vector.broadcast %cst_14 : f32 to vector<8x128xf32>
      %c0_15 = arith.constant 0 : index
      %c0_16 = arith.constant 0 : index
      %25 = vector.load %arg4[%c0_15, %c0_16] : memref<8x128xf32, #tpu.memory_space<vmem>>, vector<8x128xf32>
      tpu.vector_store %arg4[%c0_15, %c0_16], %24 {strides = array<i32>} : memref<8x128xf32, #tpu.memory_space<vmem>>, vector<8x128xf32>,
      %cst_17 = arith.constant 0.000000e+00 : f32
      %26 = vector.broadcast %cst_17 : f32 to vector<8x128xf32>
      %c0_18 = arith.constant 0 : index
      %c0_19 = arith.constant 0 : index
      %27 = vector.load %arg5[%c0_18, %c0_19] : memref<8x128xf32, #tpu.memory_space<vmem>>, vector<8x128xf32>
      tpu.vector_store %arg5[%c0_18, %c0_19], %26 {strides = array<i32>} : memref<8x128xf32, #tpu.memory_space<vmem>>, vector<8x128xf32>,
    } else {
    }
    %c0 = arith.constant 0 : index
    %c0_1 = arith.constant 0 : index
    %3 = vector.load %arg2[%c0, %c0_1] : memref<32x128xf32, #tpu.memory_space<vmem>>, vector<32x128xf32>
    %c1_i32 = arith.constant 1 : i32
    %4 = arith.cmpi eq, %arg0, %c1_i32 : i32
    %c8_i32 = arith.constant 8 : i32
    %c32_i32 = arith.constant 32 : i32
    %5 = arith.select %4, %c8_i32, %c32_i32 : i32
    %6 = tpu.iota {dimensions = array<i32: 0>} : vector<32x128xi32>
    %7 = vector.broadcast %5 : i32 to vector<32x128xi32>
    %8 = arith.cmpi slt, %6, %7 : vector<32x128xi32>
    %cst = arith.constant 0.000000e+00 : f32
    %9 = vector.broadcast %cst : f32 to vector<32x128xf32>
    %10 = arith.select %8, %3, %9 : vector<32x128xi1>, vector<32x128xf32>
    %11 = vector.shape_cast %10 : vector<32x128xf32> to vector<4x8x128xf32>
    %c0_2 = arith.constant 0 : index
    %c0_3 = arith.constant 0 : index
    %12 = vector.load %arg4[%c0_2, %c0_3] : memref<8x128xf32, #tpu.memory_space<vmem>>, vector<8x128xf32>
    %cst_4 = arith.constant dense<0.000000e+00> : vector<8x128xf32>
    %13 = vector.multi_reduction <add>, %11, %cst_4 [0] : vector<4x8x128xf32> to vector<8x128xf32>
    %14 = arith.addf %12, %13 : vector<8x128xf32>
    %c0_5 = arith.constant 0 : index
    %c0_6 = arith.constant 0 : index
    %15 = vector.load %arg4[%c0_5, %c0_6] : memref<8x128xf32, #tpu.memory_space<vmem>>, vector<8x128xf32>
    tpu.vector_store %arg4[%c0_5, %c0_6], %14 {strides = array<i32>} : memref<8x128xf32, #tpu.memory_space<vmem>>, vector<8x128xf32>,
    %c0_7 = arith.constant 0 : index
    %c0_8 = arith.constant 0 : index
    %16 = vector.load %arg5[%c0_7, %c0_8] : memref<8x128xf32, #tpu.memory_space<vmem>>, vector<8x128xf32>
    %17 = arith.mulf %11, %11 : vector<4x8x128xf32>
    %cst_9 = arith.constant dense<0.000000e+00> : vector<8x128xf32>
    %18 = vector.multi_reduction <add>, %17, %cst_9 [0] : vector<4x8x128xf32> to vector<8x128xf32>
    %19 = arith.addf %16, %18 : vector<8x128xf32>
    %c0_10 = arith.constant 0 : index
    %c0_11 = arith.constant 0 : index
    %20 = vector.load %arg5[%c0_10, %c0_11] : memref<8x128xf32, #tpu.memory_space<vmem>>, vector<8x128xf32>
    tpu.vector_store %arg5[%c0_10, %c0_11], %19 {strides = array<i32>} : memref<8x128xf32, #tpu.memory_space<vmem>>, vector<8x128xf32>,
    %c1_i32_12 = arith.constant 1 : i32
    %21 = arith.cmpi eq, %arg0, %c1_i32_12 : i32
    %22 = arith.extui %21 : i1 to i32
    %c0_i32_13 = arith.constant 0 : i32
    %23 = arith.cmpi ne, %22, %c0_i32_13 : i32
    scf.if %23 {
      %c0_14 = arith.constant 0 : index
      %c0_15 = arith.constant 0 : index
      %24 = vector.load %arg4[%c0_14, %c0_15] : memref<8x128xf32, #tpu.memory_space<vmem>>, vector<8x128xf32>
      %25 = vector.shape_cast %24 : vector<8x128xf32> to vector<1x8x128xf32>
      %cst_16 = arith.constant dense<0.000000e+00> : vector<1xf32>
      %26 = vector.multi_reduction <add>, %25, %cst_16 [1, 2] : vector<1x8x128xf32> to vector<1xf32>
      %27 = vector.shape_cast %26 : vector<1xf32> to vector<1x1x1xf32>
      %28 = vector.extract %27[0, 0, 0] : f32 from vector<1x1x1xf32>
      %29 = vector.broadcast %28 : f32 to vector<1x1xf32>
      %c0_17 = arith.constant 0 : index
      %c0_18 = arith.constant 0 : index
      %30 = vector.load %arg5[%c0_17, %c0_18] : memref<8x128xf32, #tpu.memory_space<vmem>>, vector<8x128xf32>
      %31 = vector.shape_cast %30 : vector<8x128xf32> to vector<1x8x128xf32>
      %cst_19 = arith.constant dense<0.000000e+00> : vector<1xf32>
      %32 = vector.multi_reduction <add>, %31, %cst_19 [1, 2] : vector<1x8x128xf32> to vector<1xf32>
      %33 = vector.shape_cast %32 : vector<1xf32> to vector<1x1x1xf32>
      %34 = vector.extract %33[0, 0, 0] : f32 from vector<1x1x1xf32>
      %35 = vector.broadcast %34 : f32 to vector<1x1xf32>
      %36 = math.sqrt %35 : vector<1x1xf32>
      %c0_20 = arith.constant 0 : index
      %c0_21 = arith.constant 0 : index
      %37 = memref.load %arg1[%c0_20, %c0_21] : memref<1x1xf32, #tpu.memory_space<smem>>
      %38 = vector.broadcast %37 : f32 to vector<1x1xf32>
      %39 = arith.subf %29, %38 : vector<1x1xf32>
      %cst_22 = arith.constant 0.000000e+00 : f32
      %40 = vector.broadcast %cst_22 : f32 to vector<1x1xf32>
      %41 = arith.maximumf %39, %40 : vector<1x1xf32>
      %42 = math.absf %39 : vector<1x1xf32>
      %cst_23 = arith.constant 0.000000e+00 : f32
      %43 = vector.broadcast %cst_23 : f32 to vector<1x1xf32>
      %44 = arith.subf %43, %42 : vector<1x1xf32>
      %45 = math.exp %44 : vector<1x1xf32>
      %46 = math.log1p %45 : vector<1x1xf32>
      %47 = arith.addf %41, %46 : vector<1x1xf32>
      %48 = arith.mulf %47, %47 : vector<1x1xf32>
      %49 = arith.addf %36, %48 : vector<1x1xf32>
      %c0_24 = arith.constant 0 : index
      %c0_25 = arith.constant 0 : index
      %50 = vector.load %arg3[%c0_24, %c0_25] : memref<1x1xf32, #tpu.memory_space<vmem>>, vector<1x1xf32>
      tpu.vector_store %arg3[%c0_24, %c0_25], %49 {strides = array<i32>} : memref<1x1xf32, #tpu.memory_space<vmem>>, vector<1x1xf32>,
    } else {
    }
    return
  }
  func.func @transform_0(%arg0: i32) -> (i32, i32) {
    %c0_i32 = arith.constant 0 : i32
    %c0_i32_0 = arith.constant 0 : i32
    %c0_i32_1 = arith.constant 0 : i32
    return %c0_i32, %c0_i32_0 : i32, i32
  }
  func.func @transform_1(%arg0: i32) -> (i32, i32) {
    %c0_i32 = arith.constant 0 : i32
    %c0_i32_0 = arith.constant 0 : i32
    return %arg0, %c0_i32 : i32, i32
  }
  func.func @transform_2(%arg0: i32) -> (i32, i32) {
    %c0_i32 = arith.constant 0 : i32
    %c0_i32_0 = arith.constant 0 : i32
    %c0_i32_1 = arith.constant 0 : i32
    return %c0_i32, %c0_i32_0 : i32, i32
  }
}

</mosaic_0001>

<bundles_post_ra>
// kernel: tpu_custom_call.1
= control target key start
LH: loop header
LB: loop body
LE: loop exit
PB: predicated region body
PF: predicated region fallthrough
CT: control target
= control target key end

     0   :  { %s617_s0 = inlined_call_operand.<no memory space> [shape: f32[1,1], index: 0, kind: input, shape index: {}]   ;;  %s618_s1 = inlined_call_operand.hbm [shape: f32[40,128], index: 1, kind: input, shape index: {}]   ;;  %s619_s2 = inlined_call_operand.hbm [shape: f32[1,1], index: 2, kind: output, shape index: {}]  }
   0x1   :  { %7 = sst [smem:[#allocation4]] %s617_s0 }
   0x2   :  { %8 = vsyncpa [#allocation6], 0 }
   0x3   :  { %10 = vsyncpa [#allocation6 + $0x1], 0 }
   0x4   :  { %11 = vsyncpa [#allocation7], 0  ;;  %s500_s11 = smov 0   ;;  %s502_s12 = smov 0  }
   0x5   :  { %s504_s13 = smov 0   ;;  %s506_s14 = smov 0  }
   0x6 LB: > { %s519_s0 = sadd.s32 4294967295, %s475_s14   ;;  %s522_s15 = sadd.s32 1, %s475_s14   ;;  %s475_s14 = sphi %s506_s14, %s624_s14   ;;  %s471_s13 = sphi %s504_s13, %s623_s13   ;;  %s467_s12 = sphi %s502_s12, %s622_s12   ;;  %s463_s11 = sphi %s500_s11, %s621_s11  }
   0x7   : > { %s42_s16 = ssub.s32 %s475_s14, %s522_s15  ;;  %s45_s17 = sadd.s32 1, %s471_s13 }
   0x8   : > { %p43_p0 = scmp.eq.s32.totalorder %s42_s16, 0  ;;  %p52_p1 = scmp.ne.s32.totalorder %s471_s13, %s467_s12 }
   0x9   : > { %p53_p2 = scmp.eq.s32.totalorder %s475_s14, 0  ;;  %p58_p3 = scmp.ne.s32.totalorder %s467_s12, %s463_s11 }
   0xa   : > { %s532_s18 = scalar_select %p43_p0, %s471_s13, %s45_s17  }
   0xb   : > { %p54_p4 = por %p53_p2, %p52_p1  ;;  %p59_p5 = scmp.eq.s32.totalorder %s519_s0, 0 }
   0xc   : > { %p317_p7 = scmp.ge.s32.totalorder %s475_s14, 2 }
   0xd   : > { %p535_p6 = por %p59_p5, %p58_p3 }
   0xe   : > { %102 = sbr.rel (%p317_p7) target bundleno = 51 (0x33), region = 20 }
  0x13   : > { %105 = sbr.rel (!%p54_p4) target bundleno = 51 (0x33), region = 24  ;;  %s106_s20 = sand.u32 (%p54_p4), 1, %s471_s13  }
  0x14   : > { %s319_s21 = sshll.u32 (%p54_p4), %s475_s14, 2  ;;  %s318_s22 = sshll.u32 (%p54_p4), %s106_s20, 5 }
  0x15   : > { %s112_s23 = ssub.s32 (%p54_p4), 5, %s319_s21  ;;  %s545_s26 = scalar_lea.sflag (%p54_p4), [#allocation6], %s106_s20 }
  0x16   : > { %p113_p8 = scmp.lt.s32.totalorder (%p54_p4), %s112_s23, 4  ;;  %s110_s27 = scalar_lea.vmem (%p54_p4), [#allocation5], %s318_s22 }
  0x18   : > { %s626_s23 = smov (!%p113_p8, %s112_s23), 4 }
  0x19   : > { %s542_s24 = sshll.u32 %s626_s23, 7 }
  0x1a   : > { %s117_s25 = ssub.s32 512, %s542_s24 }
  0x1b   : > { %118 = vsyncadd %s545_s26, %s117_s25  ;;  %p321_p9 = scmp.ne.s32.totalorder %s542_s24, 0  ;;  %s333_s28 = sshll.u32 %s475_s14, 9 }
  0x1c   : > { %s553_s3 = scalar_lea.hbm %s618_s1, %s333_s28  ;;  %s123_s4 = sshll.u32 %s110_s27, 4  ;;  %s555_s4 = int_to_ptr.vmem [resolvable:$true] %s123_s4 }
  0x1d   : > { %s387_s5 = scalar_lea.hbm %s553_s3, %s542_s24  ;;  %s391_s8 = scalar_lea.hbm %s618_s1, 640 }
  0x1e   : > { %p388_p10 = scmp.ne.s32.totalorder %s553_s3, %s387_s5  ;;  %p392_p13 = scmp.lt.s32.totalorder %s553_s3, %s618_s1 }
  0x1f   : > { %p393_p0 = scmp.lt.s32.totalorder %s391_s8, %s387_s5 }
  0x20   : > { %p389_p11 = pnand %p388_p10, %p321_p9 }
  0x21   : > { %p394_p1 = por %p393_p0, %p392_p13 }
  0x22   : > { %p390_p12 = pneg %p389_p11 }
  0x24   : > { %p395_p2 = pnand %p394_p1, %p390_p12 }
  0x26   : > { %398 = shalt.err (!%p395_p2)
}
  0x27   : > { %s399_s11 = scalar_lea.vmem %s555_s4, %s542_s24  ;;  %s477_s16 = smov [#allocation5]  }
  0x28   : > { %p400_p3 = scmp.ne.s32.totalorder %s555_s4, %s399_s11  ;;  %s403_s17 = sshll.u32 %s477_s16, 4  ;;  %s404_s17 = int_to_ptr.vmem [resolvable:$false] %s403_s17 }
  0x29   : > { %s405_s20 = scalar_lea.vmem %s404_s17, 1024  ;;  %p406_p7 = scmp.lt.s32.totalorder %s555_s4, %s404_s17 }
  0x2a   : > { %p401_p4 = pnand %p400_p3, %p321_p9  ;;  %p407_p8 = scmp.lt.s32.totalorder %s405_s20, %s399_s11 }
  0x2c   : > { %p402_p5 = pneg %p401_p4  ;;  %p408_p10 = por %p407_p8, %p406_p7 }
  0x2e   : > { %p409_p11 = pnand %p408_p10, %p402_p5 }
  0x30   : > { %412 = shalt.err (!%p409_p11)
}
  0x31   : > { %s478_s21 = smov 128   ;;  %s479_s22 = smov 8  }
  0x32   : > { %129 = dma.hbm_to_vmem [thread:$0]  (%p321_p9), %s553_s3, %s542_s24, %s555_s4, %s545_s26, %s478_s21, %s478_s21, %s479_s22  }
  0x33 PF: > { %p325_p12 = scmp.ge.s32.totalorder %s475_s14, 1  ;;  %p131_p13 = scmp.lt.s32.totalorder %s475_s14, 3 }
  0x35   : > { %p132_p0 = pnand %p325_p12, %p131_p13 }
  0x36   : > { %s137_s23 = sand.u32 (!%p132_p0), 1, %s467_s12  }
  0x37   : > { %135 = sbr.rel (%p132_p0) target bundleno = 358 (0x166), region = 28  ;;  %s326_s25 = sshll.u32 (!%p132_p0), %s137_s23, 5 }
  0x38   : > { %s138_s27 = scalar_lea.sflag (!%p132_p0), [#allocation6], %s137_s23  ;;  %s141_s28 = scalar_lea.vmem (!%p132_p0), [#allocation5], %s326_s25 }
  0x3c   : > { %454 = dma.done.wait (%p535_p6), %s138_s27, 512  }
  0x3d   : > { %456 = vsyncadd (%p535_p6), %s138_s27, 4294966784  ;;  %p327_p9 = scmp.ne.s32.totalorder %s519_s0, 0 }
  0x3f   : > { %165 = sbr.rel (%p327_p9) target bundleno = 70 (0x46), region = 36 }
  0x44   : > { %v480_v0 = vmov 0.0  }
  0x45   : > { %166 = vst [vmem:[#allocation2] sm:$0xff] %v480_v0  ;;  %167 = vst [vmem:[#allocation3] sm:$0xff] %v480_v0 }
  0x46 PF: > { %p172_p1 = scmp.eq.s32.totalorder %s519_s0, 1  ;;  %v174_v1 = vlaneseq  ;;  %v168_v3 = vld [vmem:[%s141_s28] sm:$0xff]  ;;  %v169_v4 = vld [vmem:[%s141_s28 + $0x8] sm:$0xff]  ;;  %v170_v5 = vld [vmem:[%s141_s28 + $0x10] sm:$0xff]  ;;  %p328_p6 = scmp.ne.s32.totalorder %s519_s0, 1 }
  0x47   : > { %v171_v6 = vld [vmem:[%s141_s28 + $0x18] sm:$0xff]  ;;  %s236_s19 = sld [smem:[#allocation4]] (!%p328_p6) }
  0x48   : > { %s173_s14 = scalar_select %p172_p1, 8, 32  ;;  %v175_v2 = vshrl.u32 %v174_v1, 7 }
  0x4a   : > { %v176_v7 = vadd.s32 8, %v175_v2  ;;  %v177_v8 = vadd.s32 16, %v175_v2  ;;  %v178_v9 = vadd.s32 24, %v175_v2  ;;  %v179_v10 = vstv %s173_s14 }
  0x4b   : > { %vm180_vm0 = vcmp.lt.s32.totalorder %v175_v2, %v179_v10 }
  0x4c   : > { %vm181_vm1 = vcmp.lt.s32.totalorder %v176_v7, %v179_v10  ;;  %vm182_vm2 = vcmp.lt.s32.totalorder %v177_v8, %v179_v10  ;;  %vm183_vm3 = vcmp.lt.s32.totalorder %v178_v9, %v179_v10  ;;  %v184_v11 = vsel %vm180_vm0, %v168_v3, 0.0  ;;  %v188_v22 = vld [vmem:[#allocation2] sm:$0xff]  ;;  %v194_v25 = vld [vmem:[#allocation3] sm:$0xff] }
  0x4d   : > { %v185_v12 = vsel %vm181_vm1, %v169_v4, 0.0  ;;  %v186_v13 = vsel %vm182_vm2, %v170_v5, 0.0  ;;  %v187_v14 = vsel %vm183_vm3, %v171_v6, 0.0  ;;  %v195_v15 = vmul.f32 %v184_v11, %v184_v11 }
  0x4e   : > { %v189_v16 = vadd.f32 %v185_v12, %v184_v11  ;;  %v196_v17 = vmul.f32 %v185_v12, %v185_v12  ;;  %v197_v18 = vmul.f32 %v186_v13, %v186_v13  ;;  %v198_v20 = vmul.f32 %v187_v14, %v187_v14 }
  0x50   : > { %v190_v19 = vadd.f32 %v189_v16, %v186_v13  ;;  %v199_v21 = vadd.f32 %v196_v17, %v195_v15 }
  0x52   : > { %v191_v23 = vadd.f32 %v190_v19, %v187_v14  ;;  %v200_v24 = vadd.f32 %v199_v21, %v197_v18 }
  0x54   : > { %v192_v26 = vadd.f32 %v191_v23, %v188_v22  ;;  %v201_v27 = vadd.f32 %v200_v24, %v198_v20  ;;  %206 = sbr.rel (%p328_p6) target bundleno = 343 (0x157), region = 40 }
  0x56   : > { %193 = vst [vmem:[#allocation2] sm:$0xff] %v192_v26  ;;  %v202_v28 = vadd.f32 %v201_v27, %v194_v25 }
  0x58   : > { %203 = vst [vmem:[#allocation3] sm:$0xff] %v202_v28 }
  0x59   : > { %v237_v45 = vstv %s236_s19  ;;  %vm256_vm7 = vcmask 0  }
  0x5d   : > { %v207_v29 = vld [vmem:[#allocation2] sm:$0xff] }
  0x5e   : > { %208 = vadd.xlane.f32.xlu0 %v207_v29 }
  0x5f   : > { %v218_v30 = vld [vmem:[#allocation3] sm:$0xff] }
  0x62   : > { %219 = vadd.xlane.f32.xlu0 %v218_v30 }
  0xe7   : > { %v209_v31 = vpop.xlane.xlu0 %208 }
  0xe8   : > { %v210_v32 = vrot.slane %v209_v31, 4 }
  0xea   : > { %v211_v33 = vadd.f32 %v210_v32, %v209_v31 }
  0xeb   : > { %v220_v34 = vpop.xlane.xlu0 %219 }
  0xec   : > { %v212_v35 = vrot.slane %v211_v33, 2  ;;  %v221_v36 = vrot.slane %v220_v34, 4 }
  0xee   : > { %v222_v37 = vadd.f32 %v221_v36, %v220_v34  ;;  %v213_v38 = vadd.f32 %v212_v35, %v211_v33 }
  0xf0   : > { %v223_v39 = vrot.slane %v222_v37, 2  ;;  %v214_v40 = vrot.slane %v213_v38, 1 }
  0xf2   : > { %v224_v41 = vadd.f32 %v223_v39, %v222_v37  ;;  %v215_v42 = vadd.f32 %v214_v40, %v213_v38 }
  0xf4   : > { %334 = vpush %v215_v42  ;;  %v225_v43 = vrot.slane %v224_v41, 1 }
  0xf6   : > { %v226_v44 = vadd.f32 %v225_v43, %v224_v41 }
  0xf8   : > { %336 = vpush %v226_v44 }
 0x125   : > { %s335_s24 = spop %334 }
 0x126   : > { %v217_v46 = vstv %s335_s24 }
 0x127   : > { %v238_v47 = vsub.f32 %v217_v46, %v237_v45 }
 0x129   : > { %v240_v48 = vand.u32 2147483647, %v238_v47  ;;  %s337_s26 = spop %336  ;;  %v239_v62 = vmax.f32 %v238_v47, 0.0 }
 0x12a   : > { %v228_v51 = vstv %s337_s26 }
 0x12b   : > { %v241_v49 = vsub.f32 0.0, %v240_v48  ;;  %vm231_vm4 = vcmp.eq.f32.partialorder %v228_v51, inf  ;;  %v234_v0 = vand.u32 2147483648, %v228_v51  ;;  %vm233_vm6 = vcmp.eq.f32.partialorder %v228_v51, 0.0 }
 0x12d   : > { %v242_v50 = vmul.f32 1.442695, %v241_v49 }
 0x12f   : > { %381 = vpow2.f32 %v242_v50 }
 0x130   : > { %383 = vrsqrt.f32 %v228_v51 }
 0x13c   : > { %v382_v52 = vpop.eup %381 }
 0x13d   : > { %v244_v53 = vadd.f32 1.0, %v382_v52  ;;  %v247_v54 = vmul.f32 -0.5, %v382_v52  ;;  %v384_v55 = vpop.eup %383  ;;  %v250_v57 = vand.u32 2147483647, %v382_v52 }
 0x13e   : > { %v230_v59 = vmul.f32 %v384_v55, %v228_v51 }
 0x13f   : > { %385 = vlog2.f32 %v244_v53  ;;  %v248_v56 = vadd.f32 1.0, %v247_v54  ;;  %vm251_vm5 = vcmp.lt.f32.partialorder %v250_v57, 0.0004427343 }
 0x140   : > { %v232_v2 = vsel %vm231_vm4, %v228_v51, %v230_v59 }
 0x141   : > { %v249_v61 = vmul.f32 %v382_v52, %v248_v56  ;;  %v235_v4 = vsel %vm233_vm6, %v234_v0, %v232_v2 }
 0x14c   : > { %v386_v58 = vpop.eup %385 }
 0x14d   : > { %v246_v60 = vmul.f32 0.6931472, %v386_v58 }
 0x14f   : > { %v252_v63 = vsel %vm251_vm5, %v249_v61, %v246_v60 }
 0x150   : > { %v253_v1 = vadd.f32 %v252_v63, %v239_v62 }
 0x152   : > { %v254_v3 = vmul.f32 %v253_v1, %v253_v1 }
 0x154   : > { %v255_v5 = vadd.f32 %v254_v3, %v235_v4 }
 0x156   : > { %257 = vst.msk [vmem:[#allocation8] sm:$0x1] %vm256_vm7, %v255_v5 }
 0x157 PF: > { %s481_s29 = smov [#allocation8]  }
 0x158   : > { %s265_s30 = sshll.u32 %s481_s29, 4  ;;  %s266_s30 = int_to_ptr.vmem [resolvable:$true] %s265_s30 }
 0x159   : > { %s413_s3 = scalar_lea.vmem %s266_s30, 16  ;;  %s419_s4 = scalar_lea.vmem %s266_s30, 32 }
 0x15a   : > { %p414_p2 = scmp.ne.s32.totalorder %s266_s30, %s413_s3  ;;  %p420_p5 = scmp.lt.s32.totalorder %s266_s30, %s266_s30 }
 0x15b   : > { %p421_p7 = scmp.lt.s32.totalorder %s419_s4, %s413_s3 }
 0x15c   : > { %p415_p3 = pnand %p414_p2, %p172_p1 }
 0x15d   : > { %p422_p8 = por %p421_p7, %p420_p5 }
 0x15e   : > { %p416_p4 = pneg %p415_p3 }
 0x160   : > { %p423_p10 = pnand %p422_p8, %p416_p4 }
 0x162   : > { %426 = shalt.err (!%p423_p10)
}
 0x163   : > { %340 = dma.vmem_to_hbm [thread:$0]  (%p172_p1), %s266_s30, 16, %s619_s2, [#allocation7]  }
 0x164   : > { %458 = dma.done.wait (%p172_p1), [#allocation7], 16  }
 0x165   : > { %460 = vsyncadd (%p172_p1), [#allocation7], 4294967280 }
 0x166 PF: > { %p14_p11 = scmp.ge.s32.totalorder %s522_s15, 4   ;;  %s621_s11 = smov %s467_s12 }
 0x167   : > { %s622_s12 = smov %s471_s13  ;;  %s623_s13 = smov %s532_s18 }
 0x168   : > { %s624_s14 = smov %s522_s15  ;;  %16 = sbr.rel (!%p14_p11) target bundleno = 6 (0x6), region = 73 }
 0x16d   :  { %278 = vsyncpa [#allocation6], 1 }
 0x16e   :  { %280 = vsyncpa [#allocation6 + $0x1], 1 }
 0x16f   :  { %281 = vsyncpa [#allocation7], 1 }
 0x170   :  { %283 = vsyncpa [#allocation7 + $0x1], 1 }

</bundles_post_ra>
